<compile_context>
chip_gen: v5e
topology: v5e:2x2
jax: 0.10.0
libtpu: 0.0.40
codegen_flags: <defaults>
</compile_context>

<pallas_src>
import functools

import jax
import jax.numpy as jnp
import numpy as np
from jax.experimental import pallas as pl
from jax.experimental.pallas import tpu as pltpu


def _attention_kernel(x_ref, gamma_ref, beta_ref, wqkv_ref, wout_ref, bout_ref,
                      o_ref, *, heads, dim_head, seq_len, eps, matmul_dtype):
    """One grid step == block_b batch elements (= block_b*seq_len rows).

    Perf-review changes incorporated:
      * Q/K/V projections fused into ONE lane-dense (M, D) @ (D, 3*inner)
        matmul (fills the 256-wide MXU instead of 3*H narrow (D, dh) dots).
      * Output projection fused into ONE (M, inner) @ (inner, D) matmul with
        contraction depth K = inner (heads packed back along lanes via concat)
        instead of H rank-dh matmuls accumulated on the VPU.
      * Weights kept lane-dense (D, 3*inner) / (inner, D): no head-major dh-lane
        tiles, so no ~8x lane-padding of weight VMEM / HBM DMA bytes.
      * Softmax normalization happens AFTER the PV matmul: the reciprocal scales
        the (Bt, N, dh) result, not the (Bt, N, N) probabilities (O(M*dh) vs
        O(M*N) VPU multiplies); denominator uses the EUP approx reciprocal.
      * Softmax scale folded into the W_q columns offline (free at runtime).
      * Matmul operands cast to matmul_dtype (bf16 on v6e/v7x); LayerNorm and
        softmax elementwise math stays f32 (keeps v5e's VPU off bf16 paths).
    """
    M, D = x_ref.shape
    N = seq_len
    Bt = M // N
    dh = dim_head
    inner = heads * dh

    x = x_ref[...].astype(jnp.float32)                                  # (M, D)

    # ---- LayerNorm over last dim (nn.LayerNorm, eps=1e-5), f32 ----
    mean = jnp.mean(x, axis=-1, keepdims=True)
    xc = x - mean
    var = jnp.mean(xc * xc, axis=-1, keepdims=True)
    xn = xc * jax.lax.rsqrt(var + eps)
    xn = xn * gamma_ref[...] + beta_ref[...]                            # (M, D)
    xn_mm = xn.astype(matmul_dtype)

    # ---- Fused QKV projection: one wide lane-dense matmul (scale pre-folded
    #      into the W_q columns in the wrapper) ----
    qkv = jnp.dot(xn_mm, wqkv_ref[...],
                  preferred_element_type=jnp.float32)                   # (M, 3*inner)

    # ---- Per-head attention; head outputs re-packed along lanes so the output
    #      projection is a single K=inner matmul.
    # NOTE: for heads >= 8 a heads-batched einsum / bounded-unroll fori_loop
    # over a heads-stacked layout would keep the instruction stream smaller.
    head_outs = []
    for h in range(heads):
        q = qkv[:, h * dh:(h + 1) * dh]
        k = qkv[:, inner + h * dh: inner + (h + 1) * dh]
        v = qkv[:, 2 * inner + h * dh: 2 * inner + (h + 1) * dh]
        qb = q.reshape(Bt, N, dh).astype(matmul_dtype)
        kb = k.reshape(Bt, N, dh).astype(matmul_dtype)
        vb = v.reshape(Bt, N, dh).astype(matmul_dtype)

        dots = jnp.einsum("bnd,bmd->bnm", qb, kb,
                          preferred_element_type=jnp.float32)           # (Bt, N, N)
        mx = jnp.max(dots, axis=-1, keepdims=True)
        p = jnp.exp(dots - mx)
        denom = jnp.sum(p, axis=-1, keepdims=True)                      # (Bt, N, 1)

        # Un-normalized PV matmul first; normalize the small (Bt, N, dh) result.
        oh = jnp.einsum("bnm,bmd->bnd", p.astype(matmul_dtype), vb,
                        preferred_element_type=jnp.float32)             # (Bt, N, dh)
        oh = oh * pl.reciprocal(denom, approx=True)
        head_outs.append(oh.reshape(M, dh))

    o_heads = jnp.concatenate(head_outs, axis=-1).astype(matmul_dtype)  # (M, inner)

    # ---- Fused output projection: single K=inner matmul + bias ----
    y = jnp.dot(o_heads, wout_ref[...], preferred_element_type=jnp.float32)
    y = y + bout_ref[...]
    o_ref[...] = y.astype(o_ref.dtype)


def _vmem_limit_bytes():
    """Generation-aware VMEM budget: ~80% of physical capacity, capped at 100 MiB.

    v5e/v6e (128 MiB physical) -> 100 MiB; v7x (64 MiB physical) -> ~51 MiB,
    leaving headroom for Mosaic scratch and pipeline buffers.  Falls back to a
    48 MiB limit that is safe on every generation if the query is unavailable.
    """
    try:
        cap = pltpu.get_tpu_info().vmem_capacity_bytes
        return min(int(cap * 0.8), 100 * 1024 * 1024)
    except Exception:
        return 48 * 1024 * 1024


def attention_forward(x, params, *, heads, dim_head, block_b=1,
                      matmul_dtype=jnp.bfloat16):
    """x: (B, N, D). Returns (B, N, D).

    `block_b` batch elements per grid step.  Size block_b to the per-step VMEM
    budget (roughly halve the v6e value on v7x's 64 MiB), but keep
    B // block_b >= 2 on v7x so both TensorCores get a 'parallel' grid point.
    """
    B, N, D = x.shape
    inner = heads * dim_head
    scale = dim_head ** (-0.5)
    assert B % block_b == 0, "block_b must divide the batch"

    gamma, beta, w_qkv, w_out, b_out = params

    # Lane-dense weight layouts; fold the softmax scale into the Q columns.
    wqkv = jnp.concatenate([w_qkv[:, :inner] * scale, w_qkv[:, inner:]],
                           axis=-1).astype(matmul_dtype)                # (D, 3*inner)
    wout = w_out.astype(matmul_dtype)                                   # (inner, D)
    gamma2 = gamma.reshape(1, D).astype(jnp.float32)
    beta2 = beta.reshape(1, D).astype(jnp.float32)
    bout2 = b_out.reshape(1, D).astype(jnp.float32)

    # Tokens flattened to rows: each grid step sees a tall (block_b*N, D) block
    # (reshape is free at the XLA level for row-major (B, N, D)).
    x_rows = x.reshape(B * N, D)
    rows = block_b * N

    kernel = functools.partial(_attention_kernel, heads=heads, dim_head=dim_head,
                               seq_len=N, eps=1e-5, matmul_dtype=matmul_dtype)

    # Constants (weights / LN params / bias): whole-array VMEM residents, so the
    # pipeline does not double-buffer data whose block index never changes.
    vmem_const = pl.BlockSpec(memory_space=pltpu.MemorySpace.VMEM)

    out = pl.pallas_call(
        kernel,
        out_shape=jax.ShapeDtypeStruct((B * N, D), x.dtype),
        grid_spec=pltpu.PrefetchScalarGridSpec(
            num_scalar_prefetch=0,
            grid=(B // block_b,),
            in_specs=[
                pl.BlockSpec((rows, D), lambda b: (b, 0)),   # x rows (pipelined)
                vmem_const,                                  # LN gamma
                vmem_const,                                  # LN beta
                vmem_const,                                  # W_qkv (Q cols pre-scaled)
                vmem_const,                                  # W_out
                vmem_const,                                  # b_out
            ],
            out_specs=pl.BlockSpec((rows, D), lambda b: (b, 0)),
        ),
        compiler_params=pltpu.CompilerParams(
            dimension_semantics=("parallel",),
            vmem_limit_bytes=_vmem_limit_bytes(),
        ),
    )(x_rows, gamma2, beta2, wqkv, wout, bout2)
    return out.reshape(B, N, D)
    # NOTE: for long sequences, add a KV-tile 'arbitrary' grid axis with an
    # online-softmax accumulator instead of materializing the (N, N) scores;
    # for D < 128 a lane-padded out-projection would make stores unmasked.


def attention_reference(x, params, *, heads, dim_head):
    """Pure-JAX reference mirroring the PyTorch forward (dropout disabled)."""
    gamma, beta, w_qkv, w_out, b_out = params
    inner = heads * dim_head
    scale = dim_head ** (-0.5)

    mean = jnp.mean(x, axis=-1, keepdims=True)
    var = jnp.mean((x - mean) ** 2, axis=-1, keepdims=True)
    xn = (x - mean) / jnp.sqrt(var + 1e-5) * gamma + beta

    qkv = xn @ w_qkv                                           # (B, N, 3*inner)
    q, k, v = jnp.split(qkv, 3, axis=-1)
    B, N, _ = x.shape
    reshape = lambda t: t.reshape(B, N, heads, dim_head).transpose(0, 2, 1, 3)
    q, k, v = reshape(q), reshape(k), reshape(v)               # (B, H, N, d)
    dots = jnp.einsum("bhnd,bhmd->bhnm", q, k) * scale
    attn = jax.nn.softmax(dots, axis=-1)
    out = jnp.einsum("bhnm,bhmd->bhnd", attn, v)
    out = out.transpose(0, 2, 1, 3).reshape(B, N, inner)
    return out @ w_out + b_out


if __name__ == "__main__":
    B, N, D = 2, 8, 32
    heads, dim_head = 4, 16
    inner = heads * dim_head

    key = jax.random.PRNGKey(0)
    kx, kg, kb, kq, ko, kbo = jax.random.split(key, 6)

    x = jax.random.normal(kx, (B, N, D), dtype=jnp.float32)

    # Deterministic synthetic parameters (shapes match the PyTorch module).
    gamma = 1.0 + 0.1 * jax.random.normal(kg, (D,), dtype=jnp.float32)   # LN weight
    beta = 0.1 * jax.random.normal(kb, (D,), dtype=jnp.float32)          # LN bias
    # nn.Linear(dim, 3*inner, bias=False).weight is (3*inner, dim); stored transposed.
    w_qkv = jax.random.normal(kq, (D, 3 * inner), dtype=jnp.float32) * (D ** -0.5)
    # nn.Linear(inner, dim).weight -> stored transposed (inner, dim); plus bias (dim,).
    w_out = jax.random.normal(ko, (inner, D), dtype=jnp.float32) * (inner ** -0.5)
    b_out = 0.1 * jax.random.normal(kbo, (D,), dtype=jnp.float32)
    params = (gamma, beta, w_qkv, w_out, b_out)

    y_ref = attention_reference(x, params, heads=heads, dim_head=dim_head)

    # f32 MXU operands.  block_b=1 keeps the parallel grid length at 2 so both
    # v7x TensorCores get work.  Tolerance covers the EUP approx reciprocal and
    # possible bf16-pass MXU handling of f32 operands.
    y_f32 = attention_forward(x, params, heads=heads, dim_head=dim_head,
                              block_b=1, matmul_dtype=jnp.float32)
    y_f32 = jax.block_until_ready(y_f32)
    np.testing.assert_allclose(np.asarray(y_f32), np.asarray(y_ref),
                               rtol=1e-2, atol=1e-2)

    # bf16 MXU operands (v6e/v7x fast path); looser tolerance for bf16 rounding.
    y_bf16 = attention_forward(x, params, heads=heads, dim_head=dim_head,
                               block_b=1, matmul_dtype=jnp.bfloat16)
    y_bf16 = jax.block_until_ready(y_bf16)
    np.testing.assert_allclose(np.asarray(y_bf16), np.asarray(y_ref),
                               rtol=5e-2, atol=5e-2)

    # TODO(synk): dropout is omitted (p=0.0 / eval mode -> identity).
    print("KERNEL_OK")
</pallas_src>

<mosaic_0001>
module attributes {stable_mosaic.version = 11 : i64} {
  func.func @_attention_kernel(%arg0: i32, %arg1: memref<8x32xf32, #tpu.memory_space<vmem>>, %arg2: memref<1x32xf32, #tpu.memory_space<vmem>>, %arg3: memref<1x32xf32, #tpu.memory_space<vmem>>, %arg4: memref<32x192xf32, #tpu.memory_space<vmem>>, %arg5: memref<64x32xf32, #tpu.memory_space<vmem>>, %arg6: memref<1x32xf32, #tpu.memory_space<vmem>>, %arg7: memref<8x32xf32, #tpu.memory_space<vmem>>) attributes {dimension_semantics = [#tpu.dimension_semantics<parallel>], iteration_bounds = array<i64: 2>, scalar_prefetch = 0 : i64, scratch_operands = 0 : i64, tpu.core_type = #tpu.core_type<tc>, window_params = [{transform_indices = @transform_0, window_bounds = array<i64: 8, 32>}, {pipeline_mode = #tpu.pipeline_mode<synchronous>, transform_indices = @transform_1, window_bounds = array<i64: 1, 32>}, {pipeline_mode = #tpu.pipeline_mode<synchronous>, transform_indices = @transform_2, window_bounds = array<i64: 1, 32>}, {pipeline_mode = #tpu.pipeline_mode<synchronous>, transform_indices = @transform_3, window_bounds = array<i64: 32, 192>}, {pipeline_mode = #tpu.pipeline_mode<synchronous>, transform_indices = @transform_4, window_bounds = array<i64: 64, 32>}, {pipeline_mode = #tpu.pipeline_mode<synchronous>, transform_indices = @transform_5, window_bounds = array<i64: 1, 32>}, {transform_indices = @transform_6, window_bounds = array<i64: 8, 32>}]} {
    %c0 = arith.constant 0 : index
    %c0_0 = arith.constant 0 : index
    %0 = vector.load %arg1[%c0, %c0_0] : memref<8x32xf32, #tpu.memory_space<vmem>>, vector<8x32xf32>
    %cst = arith.constant dense<0.000000e+00> : vector<8xf32>
    %1 = vector.multi_reduction <add>, %0, %cst [1] : vector<8x32xf32> to vector<8xf32>
    %2 = vector.shape_cast %1 : vector<8xf32> to vector<8x1xf32>
    %cst_1 = arith.constant 3.200000e+01 : f32
    %3 = vector.broadcast %cst_1 : f32 to vector<8x1xf32>
    %4 = arith.divf %2, %3 : vector<8x1xf32>
    %5 = vector.broadcast %4 : vector<8x1xf32> to vector<8x32xf32>
    %6 = arith.subf %0, %5 : vector<8x32xf32>
    %7 = arith.mulf %6, %6 : vector<8x32xf32>
    %cst_2 = arith.constant dense<0.000000e+00> : vector<8xf32>
    %8 = vector.multi_reduction <add>, %7, %cst_2 [1] : vector<8x32xf32> to vector<8xf32>
    %9 = vector.shape_cast %8 : vector<8xf32> to vector<8x1xf32>
    %cst_3 = arith.constant 3.200000e+01 : f32
    %10 = vector.broadcast %cst_3 : f32 to vector<8x1xf32>
    %11 = arith.divf %9, %10 : vector<8x1xf32>
    %cst_4 = arith.constant 9.99999974E-6 : f32
    %12 = vector.broadcast %cst_4 : f32 to vector<8x1xf32>
    %13 = arith.addf %11, %12 : vector<8x1xf32>
    %14 = math.rsqrt %13 : vector<8x1xf32>
    %15 = vector.broadcast %14 : vector<8x1xf32> to vector<8x32xf32>
    %16 = arith.mulf %6, %15 : vector<8x32xf32>
    %c0_5 = arith.constant 0 : index
    %c0_6 = arith.constant 0 : index
    %17 = vector.load %arg2[%c0_5, %c0_6] : memref<1x32xf32, #tpu.memory_space<vmem>>, vector<1x32xf32>
    %18 = vector.broadcast %17 : vector<1x32xf32> to vector<8x32xf32>
    %19 = arith.mulf %16, %18 : vector<8x32xf32>
    %c0_7 = arith.constant 0 : index
    %c0_8 = arith.constant 0 : index
    %20 = vector.load %arg3[%c0_7, %c0_8] : memref<1x32xf32, #tpu.memory_space<vmem>>, vector<1x32xf32>
    %21 = vector.broadcast %20 : vector<1x32xf32> to vector<8x32xf32>
    %22 = arith.addf %19, %21 : vector<8x32xf32>
    %c0_9 = arith.constant 0 : index
    %c0_10 = arith.constant 0 : index
    %23 = vector.load %arg4[%c0_9, %c0_10] : memref<32x192xf32, #tpu.memory_space<vmem>>, vector<32x192xf32>
    %cst_11 = arith.constant dense<0.000000e+00> : vector<8x192xf32>
    %24 = tpu.matmul %22, %23, %cst_11 {dimension_numbers = #tpu.dot_dimension_numbers<[1], [0], [0], [1], [0, 0, 1, 1], [], []>} : vector<8x32xf32>, vector<32x192xf32>, vector<8x192xf32> -> vector<8x192xf32>
    %25 = vector.extract_strided_slice %24 {offsets = [0, 0], sizes = [8, 16], strides = [1, 1]} : vector<8x192xf32> to vector<8x16xf32>
    %26 = vector.extract_strided_slice %24 {offsets = [0, 64], sizes = [8, 16], strides = [1, 1]} : vector<8x192xf32> to vector<8x16xf32>
    %27 = vector.extract_strided_slice %24 {offsets = [0, 128], sizes = [8, 16], strides = [1, 1]} : vector<8x192xf32> to vector<8x16xf32>
    %28 = vector.shape_cast %25 : vector<8x16xf32> to vector<1x8x16xf32>
    %29 = vector.shape_cast %26 : vector<8x16xf32> to vector<1x8x16xf32>
    %30 = vector.shape_cast %27 : vector<8x16xf32> to vector<1x8x16xf32>
    "tpu.trace_start"() <{level = 10 : i32, message = "bnd,bmd->bnm"}> : () -> ()
    %cst_12 = arith.constant dense<0.000000e+00> : vector<1x8x8xf32>
    %31 = tpu.matmul %28, %29, %cst_12 {dimension_numbers = #tpu.dot_dimension_numbers<[2], [2], [1], [1], [0, 0, 0, 1, 1, 1], [0], [0]>} : vector<1x8x16xf32>, vector<1x8x16xf32>, vector<1x8x8xf32> -> vector<1x8x8xf32>
    "tpu.trace_stop"() : () -> ()
    %cst_13 = arith.constant dense<0xFF800000> : vector<1x8xf32>
    %32 = vector.multi_reduction <maximumf>, %31, %cst_13 [2] : vector<1x8x8xf32> to vector<1x8xf32>
    %33 = vector.shape_cast %32 : vector<1x8xf32> to vector<1x8x1xf32>
    %34 = vector.broadcast %33 : vector<1x8x1xf32> to vector<1x8x8xf32>
    %35 = arith.subf %31, %34 : vector<1x8x8xf32>
    %36 = math.exp %35 : vector<1x8x8xf32>
    %cst_14 = arith.constant dense<0.000000e+00> : vector<1x8xf32>
    %37 = vector.multi_reduction <add>, %36, %cst_14 [2] : vector<1x8x8xf32> to vector<1x8xf32>
    %38 = vector.shape_cast %37 : vector<1x8xf32> to vector<1x8x1xf32>
    "tpu.trace_start"() <{level = 10 : i32, message = "bnm,bmd->bnd"}> : () -> ()
    %cst_15 = arith.constant dense<0.000000e+00> : vector<1x8x16xf32>
    %39 = tpu.matmul %36, %30, %cst_15 {dimension_numbers = #tpu.dot_dimension_numbers<[2], [1], [1], [2], [0, 0, 0, 1, 1, 2], [0], [0]>} : vector<1x8x8xf32>, vector<1x8x16xf32>, vector<1x8x16xf32> -> vector<1x8x16xf32>
    "tpu.trace_stop"() : () -> ()
    %40 = tpu.reciprocal %38 {approx = true} : vector<1x8x1xf32> -> vector<1x8x1xf32>
    %41 = vector.broadcast %40 : vector<1x8x1xf32> to vector<1x8x16xf32>
    %42 = arith.mulf %39, %41 : vector<1x8x16xf32>
    %43 = vector.shape_cast %42 : vector<1x8x16xf32> to vector<8x16xf32>
    %44 = vector.extract_strided_slice %24 {offsets = [0, 16], sizes = [8, 16], strides = [1, 1]} : vector<8x192xf32> to vector<8x16xf32>
    %45 = vector.extract_strided_slice %24 {offsets = [0, 80], sizes = [8, 16], strides = [1, 1]} : vector<8x192xf32> to vector<8x16xf32>
    %46 = vector.extract_strided_slice %24 {offsets = [0, 144], sizes = [8, 16], strides = [1, 1]} : vector<8x192xf32> to vector<8x16xf32>
    %47 = vector.shape_cast %44 : vector<8x16xf32> to vector<1x8x16xf32>
    %48 = vector.shape_cast %45 : vector<8x16xf32> to vector<1x8x16xf32>
    %49 = vector.shape_cast %46 : vector<8x16xf32> to vector<1x8x16xf32>
    "tpu.trace_start"() <{level = 10 : i32, message = "bnd,bmd->bnm"}> : () -> ()
    %cst_16 = arith.constant dense<0.000000e+00> : vector<1x8x8xf32>
    %50 = tpu.matmul %47, %48, %cst_16 {dimension_numbers = #tpu.dot_dimension_numbers<[2], [2], [1], [1], [0, 0, 0, 1, 1, 1], [0], [0]>} : vector<1x8x16xf32>, vector<1x8x16xf32>, vector<1x8x8xf32> -> vector<1x8x8xf32>
    "tpu.trace_stop"() : () -> ()
    %cst_17 = arith.constant dense<0xFF800000> : vector<1x8xf32>
    %51 = vector.multi_reduction <maximumf>, %50, %cst_17 [2] : vector<1x8x8xf32> to vector<1x8xf32>
    %52 = vector.shape_cast %51 : vector<1x8xf32> to vector<1x8x1xf32>
    %53 = vector.broadcast %52 : vector<1x8x1xf32> to vector<1x8x8xf32>
    %54 = arith.subf %50, %53 : vector<1x8x8xf32>
    %55 = math.exp %54 : vector<1x8x8xf32>
    %cst_18 = arith.constant dense<0.000000e+00> : vector<1x8xf32>
    %56 = vector.multi_reduction <add>, %55, %cst_18 [2] : vector<1x8x8xf32> to vector<1x8xf32>
    %57 = vector.shape_cast %56 : vector<1x8xf32> to vector<1x8x1xf32>
    "tpu.trace_start"() <{level = 10 : i32, message = "bnm,bmd->bnd"}> : () -> ()
    %cst_19 = arith.constant dense<0.000000e+00> : vector<1x8x16xf32>
    %58 = tpu.matmul %55, %49, %cst_19 {dimension_numbers = #tpu.dot_dimension_numbers<[2], [1], [1], [2], [0, 0, 0, 1, 1, 2], [0], [0]>} : vector<1x8x8xf32>, vector<1x8x16xf32>, vector<1x8x16xf32> -> vector<1x8x16xf32>
    "tpu.trace_stop"() : () -> ()
    %59 = tpu.reciprocal %57 {approx = true} : vector<1x8x1xf32> -> vector<1x8x1xf32>
    %60 = vector.broadcast %59 : vector<1x8x1xf32> to vector<1x8x16xf32>
    %61 = arith.mulf %58, %60 : vector<1x8x16xf32>
    %62 = vector.shape_cast %61 : vector<1x8x16xf32> to vector<8x16xf32>
    %63 = vector.extract_strided_slice %24 {offsets = [0, 32], sizes = [8, 16], strides = [1, 1]} : vector<8x192xf32> to vector<8x16xf32>
    %64 = vector.extract_strided_slice %24 {offsets = [0, 96], sizes = [8, 16], strides = [1, 1]} : vector<8x192xf32> to vector<8x16xf32>
    %65 = vector.extract_strided_slice %24 {offsets = [0, 160], sizes = [8, 16], strides = [1, 1]} : vector<8x192xf32> to vector<8x16xf32>
    %66 = vector.shape_cast %63 : vector<8x16xf32> to vector<1x8x16xf32>
    %67 = vector.shape_cast %64 : vector<8x16xf32> to vector<1x8x16xf32>
    %68 = vector.shape_cast %65 : vector<8x16xf32> to vector<1x8x16xf32>
    "tpu.trace_start"() <{level = 10 : i32, message = "bnd,bmd->bnm"}> : () -> ()
    %cst_20 = arith.constant dense<0.000000e+00> : vector<1x8x8xf32>
    %69 = tpu.matmul %66, %67, %cst_20 {dimension_numbers = #tpu.dot_dimension_numbers<[2], [2], [1], [1], [0, 0, 0, 1, 1, 1], [0], [0]>} : vector<1x8x16xf32>, vector<1x8x16xf32>, vector<1x8x8xf32> -> vector<1x8x8xf32>
    "tpu.trace_stop"() : () -> ()
    %cst_21 = arith.constant dense<0xFF800000> : vector<1x8xf32>
    %70 = vector.multi_reduction <maximumf>, %69, %cst_21 [2] : vector<1x8x8xf32> to vector<1x8xf32>
    %71 = vector.shape_cast %70 : vector<1x8xf32> to vector<1x8x1xf32>
    %72 = vector.broadcast %71 : vector<1x8x1xf32> to vector<1x8x8xf32>
    %73 = arith.subf %69, %72 : vector<1x8x8xf32>
    %74 = math.exp %73 : vector<1x8x8xf32>
    %cst_22 = arith.constant dense<0.000000e+00> : vector<1x8xf32>
    %75 = vector.multi_reduction <add>, %74, %cst_22 [2] : vector<1x8x8xf32> to vector<1x8xf32>
    %76 = vector.shape_cast %75 : vector<1x8xf32> to vector<1x8x1xf32>
    "tpu.trace_start"() <{level = 10 : i32, message = "bnm,bmd->bnd"}> : () -> ()
    %cst_23 = arith.constant dense<0.000000e+00> : vector<1x8x16xf32>
    %77 = tpu.matmul %74, %68, %cst_23 {dimension_numbers = #tpu.dot_dimension_numbers<[2], [1], [1], [2], [0, 0, 0, 1, 1, 2], [0], [0]>} : vector<1x8x8xf32>, vector<1x8x16xf32>, vector<1x8x16xf32> -> vector<1x8x16xf32>
    "tpu.trace_stop"() : () -> ()
    %78 = tpu.reciprocal %76 {approx = true} : vector<1x8x1xf32> -> vector<1x8x1xf32>
    %79 = vector.broadcast %78 : vector<1x8x1xf32> to vector<1x8x16xf32>
    %80 = arith.mulf %77, %79 : vector<1x8x16xf32>
    %81 = vector.shape_cast %80 : vector<1x8x16xf32> to vector<8x16xf32>
    %82 = vector.extract_strided_slice %24 {offsets = [0, 48], sizes = [8, 16], strides = [1, 1]} : vector<8x192xf32> to vector<8x16xf32>
    %83 = vector.extract_strided_slice %24 {offsets = [0, 112], sizes = [8, 16], strides = [1, 1]} : vector<8x192xf32> to vector<8x16xf32>
    %84 = vector.extract_strided_slice %24 {offsets = [0, 176], sizes = [8, 16], strides = [1, 1]} : vector<8x192xf32> to vector<8x16xf32>
    %85 = vector.shape_cast %82 : vector<8x16xf32> to vector<1x8x16xf32>
    %86 = vector.shape_cast %83 : vector<8x16xf32> to vector<1x8x16xf32>
    %87 = vector.shape_cast %84 : vector<8x16xf32> to vector<1x8x16xf32>
    "tpu.trace_start"() <{level = 10 : i32, message = "bnd,bmd->bnm"}> : () -> ()
    %cst_24 = arith.constant dense<0.000000e+00> : vector<1x8x8xf32>
    %88 = tpu.matmul %85, %86, %cst_24 {dimension_numbers = #tpu.dot_dimension_numbers<[2], [2], [1], [1], [0, 0, 0, 1, 1, 1], [0], [0]>} : vector<1x8x16xf32>, vector<1x8x16xf32>, vector<1x8x8xf32> -> vector<1x8x8xf32>
    "tpu.trace_stop"() : () -> ()
    %cst_25 = arith.constant dense<0xFF800000> : vector<1x8xf32>
    %89 = vector.multi_reduction <maximumf>, %88, %cst_25 [2] : vector<1x8x8xf32> to vector<1x8xf32>
    %90 = vector.shape_cast %89 : vector<1x8xf32> to vector<1x8x1xf32>
    %91 = vector.broadcast %90 : vector<1x8x1xf32> to vector<1x8x8xf32>
    %92 = arith.subf %88, %91 : vector<1x8x8xf32>
    %93 = math.exp %92 : vector<1x8x8xf32>
    %cst_26 = arith.constant dense<0.000000e+00> : vector<1x8xf32>
    %94 = vector.multi_reduction <add>, %93, %cst_26 [2] : vector<1x8x8xf32> to vector<1x8xf32>
    %95 = vector.shape_cast %94 : vector<1x8xf32> to vector<1x8x1xf32>
    "tpu.trace_start"() <{level = 10 : i32, message = "bnm,bmd->bnd"}> : () -> ()
    %cst_27 = arith.constant dense<0.000000e+00> : vector<1x8x16xf32>
    %96 = tpu.matmul %93, %87, %cst_27 {dimension_numbers = #tpu.dot_dimension_numbers<[2], [1], [1], [2], [0, 0, 0, 1, 1, 2], [0], [0]>} : vector<1x8x8xf32>, vector<1x8x16xf32>, vector<1x8x16xf32> -> vector<1x8x16xf32>
    "tpu.trace_stop"() : () -> ()
    %97 = tpu.reciprocal %95 {approx = true} : vector<1x8x1xf32> -> vector<1x8x1xf32>
    %98 = vector.broadcast %97 : vector<1x8x1xf32> to vector<1x8x16xf32>
    %99 = arith.mulf %96, %98 : vector<1x8x16xf32>
    %100 = vector.shape_cast %99 : vector<1x8x16xf32> to vector<8x16xf32>
    %101 = tpu.concatenate %43, %62, %81, %100 in 1 : vector<8x16xf32>, vector<8x16xf32>, vector<8x16xf32>, vector<8x16xf32> -> vector<8x64xf32>
    %c0_28 = arith.constant 0 : index
    %c0_29 = arith.constant 0 : index
    %102 = vector.load %arg5[%c0_28, %c0_29] : memref<64x32xf32, #tpu.memory_space<vmem>>, vector<64x32xf32>
    %cst_30 = arith.constant dense<0.000000e+00> : vector<8x32xf32>
    %103 = tpu.matmul %101, %102, %cst_30 {dimension_numbers = #tpu.dot_dimension_numbers<[1], [0], [0], [1], [0, 0, 1, 1], [], []>} : vector<8x64xf32>, vector<64x32xf32>, vector<8x32xf32> -> vector<8x32xf32>
    %c0_31 = arith.constant 0 : index
    %c0_32 = arith.constant 0 : index
    %104 = vector.load %arg6[%c0_31, %c0_32] : memref<1x32xf32, #tpu.memory_space<vmem>>, vector<1x32xf32>
    %105 = vector.broadcast %104 : vector<1x32xf32> to vector<8x32xf32>
    %106 = arith.addf %103, %105 : vector<8x32xf32>
    %c0_33 = arith.constant 0 : index
    %c0_34 = arith.constant 0 : index
    %107 = vector.load %arg7[%c0_33, %c0_34] : memref<8x32xf32, #tpu.memory_space<vmem>>, vector<8x32xf32>
    tpu.vector_store %arg7[%c0_33, %c0_34], %106 {strides = array<i32>} : memref<8x32xf32, #tpu.memory_space<vmem>>, vector<8x32xf32>,
    return
  }
  func.func @transform_0(%arg0: i32) -> (i32, i32) {
    %c0_i32 = arith.constant 0 : i32
    %c0_i32_0 = arith.constant 0 : i32
    return %arg0, %c0_i32 : i32, i32
  }
  func.func @transform_1(%arg0: i32) -> (i32, i32) {
    %c0_i32 = arith.constant 0 : i32
    %c0_i32_0 = arith.constant 0 : i32
    %c0_i32_1 = arith.constant 0 : i32
    return %c0_i32, %c0_i32_0 : i32, i32
  }
  func.func @transform_2(%arg0: i32) -> (i32, i32) {
    %c0_i32 = arith.constant 0 : i32
    %c0_i32_0 = arith.constant 0 : i32
    %c0_i32_1 = arith.constant 0 : i32
    return %c0_i32, %c0_i32_0 : i32, i32
  }
  func.func @transform_3(%arg0: i32) -> (i32, i32) {
    %c0_i32 = arith.constant 0 : i32
    %c0_i32_0 = arith.constant 0 : i32
    %c0_i32_1 = arith.constant 0 : i32
    return %c0_i32, %c0_i32_0 : i32, i32
  }
  func.func @transform_4(%arg0: i32) -> (i32, i32) {
    %c0_i32 = arith.constant 0 : i32
    %c0_i32_0 = arith.constant 0 : i32
    %c0_i32_1 = arith.constant 0 : i32
    return %c0_i32, %c0_i32_0 : i32, i32
  }
  func.func @transform_5(%arg0: i32) -> (i32, i32) {
    %c0_i32 = arith.constant 0 : i32
    %c0_i32_0 = arith.constant 0 : i32
    %c0_i32_1 = arith.constant 0 : i32
    return %c0_i32, %c0_i32_0 : i32, i32
  }
  func.func @transform_6(%arg0: i32) -> (i32, i32) {
    %c0_i32 = arith.constant 0 : i32
    %c0_i32_0 = arith.constant 0 : i32
    return %arg0, %c0_i32 : i32, i32
  }
}

</mosaic_0001>

<bundles_post_ra>
// kernel: tpu_custom_call.1
= control target key start
LH: loop header
LB: loop body
LE: loop exit
PB: predicated region body
PF: predicated region fallthrough
CT: control target
= control target key end

     0   :  { %11 = vsyncpa [#allocation3], 0  ;;  %s1110_s0 = inlined_call_operand.vmem [shape: f32[16,32], index: 0, kind: input, shape index: {}]   ;;  %s1111_s1 = inlined_call_operand.vmem [shape: f32[1,32], index: 1, kind: input, shape index: {}]   ;;  %s1112_s2 = inlined_call_operand.vmem [shape: f32[1,32], index: 2, kind: input, shape index: {}]   ;;  %s1113_s3 = inlined_call_operand.vmem [shape: f32[32,192], index: 3, kind: input, shape index: {}]   ;;  %s1114_s4 = inlined_call_operand.vmem [shape: f32[64,32], index: 4, kind: input, shape index: {}]   ;;  %s1115_s5 = inlined_call_operand.vmem [shape: f32[1,32], index: 5, kind: input, shape index: {}]   ;;  %s1116_s6 = inlined_call_operand.hbm [shape: f32[16,32], index: 6, kind: output, shape index: {}]  }
   0x1   :  { %13 = vsyncpa [#allocation3 + $0x1], 0  ;;  %s928_s21 = smov 0   ;;  %s930_s22 = smov 0  }
   0x2   :  { %s932_s23 = smov 0   ;;  %s934_s24 = smov 0  }
   0x3 LB: > { %s949_s25 = sadd.s32 4294967295, %s883_s24   ;;  %s726_s26 = sadd.s32 4294967294, %s883_s24   ;;  %s883_s24 = sphi %s934_s24, %s1122_s24   ;;  %s879_s23 = sphi %s932_s23, %s1121_s23   ;;  %s875_s22 = sphi %s930_s22, %s1120_s22   ;;  %s871_s21 = sphi %s928_s21, %s1119_s21  }
   0x4   : > { %s953_s27 = sadd.s32 1, %s883_s24   ;;  %s157_s28 = sadd.s32 1, %s879_s23 }
   0x5   : > { %s154_s29 = ssub.s32 %s883_s24, %s953_s27  ;;  %p167_p0 = scmp.ne.s32.totalorder %s879_s23, %s875_s22 }
   0x6   : > { %p155_p1 = scmp.eq.s32.totalorder %s154_s29, 0  ;;  %p168_p2 = scmp.eq.s32.totalorder %s949_s25, 1 }
   0x7   : > { %p173_p3 = scmp.ne.s32.totalorder %s875_s22, %s871_s21  ;;  %p174_p4 = scmp.eq.s32.totalorder %s726_s26, 1 }
   0x8   : > { %s964_s30 = scalar_select %p155_p1, %s879_s23, %s157_s28  }
   0x9   : > { %p966_p5 = por %p168_p2, %p167_p0  ;;  %p970_p6 = por %p174_p4, %p173_p3 }
   0xa   : > { %p729_p7 = scmp.ge.s32.totalorder %s883_s24, 1  ;;  %p214_p8 = scmp.lt.s32.totalorder %s883_s24, 3 }
   0xc   : > { %p215_p9 = pnand %p729_p7, %p214_p8 }
   0xd   : > { %p243_p10 = scmp.lt.s32.totalorder (!%p215_p9), %s949_s25, 1  ;;  %s886_s19 = smov (!%p215_p9), 16  }
   0xe   : > { %218 = sbr.rel (%p215_p9) target bundleno = 1448 (0x5a8), region = 44  ;;  %s887_s20 = smov (!%p215_p9), 48  }
   0xf   : > { %s888_s26 = smov (!%p215_p9), 64   ;;  %s889_s28 = smov (!%p215_p9), 112  }
  0x10   : > { %s890_s29 = smov (!%p215_p9), 80   ;;  %s240_s12 = sand.u32 (!%p215_p9), 1, %s875_s22  }
  0x11   : > { %s748_s14 = sshll.u32 (!%p215_p9), %s949_s25, 3 }
  0x12   : > { %s662_s17 = scalar_lea.hbm (!%p215_p9), %s1116_s6, %s748_s14 }
  0x13   : > { %s244_s9 = scalar_select %p243_p10, %s949_s25, 1  ;;  %vm248_vm0 = vcmask 261120   ;;  %v885_v2 = vmov 32.0   ;;  %v294_v14 = vld [vmem:[%s1113_s3 + $0x30] sm:$0xff]  ;;  %v292_v15 = vld [vmem:[%s1113_s3 + $0x20] sm:$0xff]  ;;  %v295_v18 = vld [vmem:[%s1113_s3 + $0x38] sm:$0xff] }
  0x14   : > { %801 = vrcp.f32 %v885_v2  ;;  %311 = vmatpush.msra.mxu1 %v294_v14  ;;  %v290_v16 = vld [vmem:[%s1113_s3 + $0x10] sm:$0xff]  ;;  %v288_v17 = vld [vmem:[%s1113_s3] sm:$0xff]  ;;  %v293_v19 = vld [vmem:[%s1113_s3 + $0x28] sm:$0xff]  ;;  %vm342_vm5 = vcmask 130048   ;;  %vm367_vm6 = vcmask 64512   ;;  %vm612_vm7 = vcmask 392192  }
  0x15   : > { %s731_s10 = sshll.u32 %s244_s9, 3  ;;  %v291_v20 = vld [vmem:[%s1113_s3 + $0x18] sm:$0xff]  ;;  %v289_v23 = vld [vmem:[%s1113_s3 + $0x8] sm:$0xff]  ;;  %v798_v31 = vld [vmem:[%s1111_s1] ss:$0 sm:$0xff]  ;;  %s891_s9 = smov 32  }
  0x16   : > { %s246_s13 = scalar_lea.vmem %s1110_s0, %s731_s10  ;;  %312 = vmatpush.msra.mxu1 %v292_v15  ;;  %v799_v34 = vld [vmem:[%s1112_s2] ss:$0 sm:$0xff]  ;;  %s892_s10 = smov 96   ;;  %vm626_vm8 = vcmask 523264  }
  0x17   : > { %v247_v0 = vld [vmem:[%s246_s13] sm:$0xff]  ;;  %s730_s13 = sshll.u32 %s240_s12, 3 }
  0x18   : > { %v249_v1 = vsel %vm248_vm0, %v247_v0, 0.0  ;;  %313 = vmatpush.msra.mxu1 %v290_v16 }
  0x19   : > { %250 = vadd.xlane.f32.xlu0 %v249_v1 }
  0x1a   : > { %v802_v3 = vpop.eup %801  ;;  %314 = vmatpush.msra.mxu1 %v288_v17 }
  0x1b   : > { %v253_v4 = vmul.f32 32.0, %v802_v3  ;;  %vm257_vm1 = vweird.f32 %v802_v3 }
  0x1c   : > { %331 = vmatpush.msrb.mxu1 %v295_v18 }
  0x1d   : > { %v254_v5 = vsub.f32 1.0, %v253_v4 }
  0x1e   : > { %332 = vmatpush.msrb.mxu1 %v293_v19 }
  0x1f   : > { %v255_v6 = vmul.f32 %v802_v3, %v254_v5 }
  0x20   : > { %333 = vmatpush.msrb.mxu1 %v291_v20 }
  0x21   : > { %v256_v7 = vadd.f32 %v802_v3, %v255_v6 }
  0x22   : > { %334 = vmatpush.msrb.mxu1 %v289_v23 }
  0x23   : > { %v258_v8 = vsel %vm257_vm1, %v802_v3, %v256_v7 }
  0x8c   : > { %v251_v9 = vpop.xlane.xlu0 %250 }
  0x8d   : > { %v259_v10 = vmul.f32 %v258_v8, %v251_v9 }
  0x8f   : > { %v260_v11 = vsub.f32 %v247_v0, %v259_v10 }
  0x91   : > { %v261_v12 = vmul.f32 %v260_v11, %v260_v11 }
  0x93   : > { %v262_v13 = vsel %vm248_vm0, %v261_v12, 0.0 }
  0x94   : > { %263 = vadd.xlane.f32.xlu0 %v262_v13 }
 0x107   : > { %v264_v21 = vpop.xlane.xlu0 %263 }
 0x108   : > { %v265_v22 = vmul.f32 %v264_v21, %v258_v8 }
 0x10a   : > { %v266_v24 = vadd.f32 1e-05, %v265_v22 }
 0x10c   : > { %803 = vrsqrt.f32 %v266_v24  ;;  %vm273_vm3 = vweird.f32 %v266_v24 }
 0x112   : > { %v804_v25 = vpop.eup %803 }
 0x113   : > { %v268_v26 = vmul.f32 %v804_v25, %v266_v24  ;;  %vm274_vm2 = vweird.f32 %v804_v25 }
 0x114   : > { %vm275_vm4 = vmor %vm273_vm3, %vm274_vm2 }
 0x115   : > { %v269_v27 = vmul.f32 %v804_v25, %v268_v26  ;;  %v621_v26 = vld [vmem:[%s1114_s4 + $0x38] sm:$0xff] }
 0x117   : > { %v270_v28 = vmul.f32 0.5, %v269_v27  ;;  %v620_v27 = vld [vmem:[%s1114_s4 + $0x30] sm:$0xff] }
 0x119   : > { %v271_v29 = vsub.f32 1.5, %v270_v28  ;;  %v619_v28 = vld [vmem:[%s1114_s4 + $0x28] sm:$0xff] }
 0x11b   : > { %v272_v30 = vmul.f32 %v804_v25, %v271_v29  ;;  %v618_v29 = vld [vmem:[%s1114_s4 + $0x20] sm:$0xff] }
 0x11d   : > { %v276_v32 = vsel %vm275_vm4, %v804_v25, %v272_v30  ;;  %v617_v30 = vld [vmem:[%s1114_s4 + $0x18] sm:$0xff] }
 0x11e   : > { %v277_v33 = vmul.f32 %v276_v32, %v260_v11  ;;  %v615_v32 = vld [vmem:[%s1114_s4 + $0x8] sm:$0xff] }
 0x120   : > { %v282_v35 = vmul.f32 %v798_v31, %v277_v33  ;;  %v616_v31 = vld [vmem:[%s1114_s4 + $0x10] sm:$0xff]  ;;  %v614_v33 = vld [vmem:[%s1114_s4] sm:$0xff] }
 0x122   : > { %v287_v36 = vadd.f32 %v799_v34, %v282_v35 }
 0x124   : > { %732 = vmatmul.msk.f32.vlgmr.msra.gmra.mxu1 %vm248_vm0, %v287_v36 }
 0x12c   : > { %733 = vmatmul.msk.f32.vlgmr.msrb.gmra.mxu1 %vm248_vm0, %v287_v36 }
 0x1a1   : > { %v316_v37 = vpop.f32.mrf.mxu1 }
 0x1a2   : > { %535 = vrot.lane.b32.xlu0 %v316_v37, %s886_s19  ;;  %404 = vrot.lane.b32.xlu2 %v316_v37, %s887_s20 }
 0x1a3   : > { %340 = vrot.lane.b32.xlu1 %v316_v37, %s888_s26 }
 0x1a9   : > { %v336_v38 = vpop.f32.mrf.mxu1 }
 0x1aa   : > { %402 = vrot.lane.b32.xlu2 %v316_v37, %s889_s28  ;;  %395 = vmatpush.msra.mxu3 %v336_v38 }
 0x1b2   : > { %533 = vrot.lane.b32.xlu2 %v316_v37, %s890_s29 }
 0x1ba   : > { %470 = vrot.lane.b32.xlu2 %v316_v37, %s891_s9 }
 0x1c2   : > { %468 = vrot.lane.b32.xlu2 %v316_v37, %s892_s10 }
 0x1fc   : > { %v405_v39 = vpop.permute.xlu2 %404 }
 0x1fd   : > { %737 = vmatpush.xpose.msk.msrb.mxu3 %vm342_vm5, %v405_v39 }
 0x204   : > { %v403_v40 = vpop.permute.xlu2 %402 }
 0x20c   : > { %v534_v41 = vpop.permute.xlu2 %533 }
 0x214   : > { %v471_v42 = vpop.permute.xlu2 %470  ;;  %v536_v53 = vpop.permute.xlu0 %535 }
 0x215   : > { %v341_v43 = vpop.permute.xlu1 %340  ;;  %740 = vmatpush.xpose.msk.msra.mxu0 %vm342_vm5, %v471_v42 }
 0x216   : > { %734 = vmatpush.xpose.msk.msra.mxu2 %vm342_vm5, %v341_v43  ;;  %v800_v43 = vld [vmem:[%s1115_s5] ss:$0 sm:$0xff] }
 0x219   : > { %735 = vmatmul.msk.f32.vlgmr.msra.gmra.mxu2 %vm342_vm5, %v316_v37  ;;  %638 = vmatpush.msrb.mxu0 %v621_v26 }
 0x21b   : > { %639 = vmatpush.msrb.mxu0 %v620_v27 }
 0x21c   : > { %v469_v44 = vpop.permute.xlu2 %468 }
 0x21d   : > { %741 = vmatmul.msk.f32.vlgmr.msra.gmra.mxu0 %vm342_vm5, %v469_v44 }
 0x21e   : > { %640 = vmatpush.msrb.mxu0 %v619_v28 }
 0x220   : > { %641 = vmatpush.msrb.mxu0 %v618_v29 }
 0x222   : > { %642 = vmatpush.msrb.mxu0 %v617_v30 }
 0x224   : > { %643 = vmatpush.msrb.mxu0 %v616_v31 }
 0x226   : > { %644 = vmatpush.msrb.mxu0 %v615_v32 }
 0x228   : > { %645 = vmatpush.msrb.mxu0 %v614_v33 }
 0x29a   : > { %v493_v47 = vpop.f32.mrf.mxu0 }
 0x29b   : > { %v496_v48 = vsel %vm367_vm6, %v493_v47, -inf }
 0x29c   : > { %v364_v45 = vpop.f32.mrf.mxu2 }
 0x29d   : > { %v368_v46 = vsel %vm367_vm6, %v364_v45, -inf }
 0x29e   : > { %369 = vmax.xlane.f32.xlu1 %v368_v46 }
 0x2b7   : > { %440 = vrot.lane.b32.xlu1 %v336_v38, %s889_s28  ;;  %s666_s28 = sshll.u32 %s662_s17, 4  ;;  %s667_s28 = int_to_ptr.hbm [resolvable:$true] %s666_s28 }
 0x2b8   : > { %s835_s25 = sshra.s32 %s667_s28, 4  ;;  %s836_s25 = int_to_ptr.hbm [resolvable:$true] %s835_s25 }
 0x2b9   : > { %p842_p0 = scmp.lt.s32.totalorder %s836_s25, %s1116_s6 }
 0x2e1   : > { %497 = vmax.xlane.f32.xlu1 %v496_v48 }
 0x311   : > { %v370_v49 = vpop.xlane.xlu1 %369 }
 0x312   : > { %v371_v50 = vsub.f32 %v364_v45, %v370_v49 }
 0x314   : > { %v372_v51 = vmul.f32 1.442695, %v371_v50 }
 0x316   : > { %805 = vpow2.f32 %v372_v51 }
 0x31c   : > { %v806_v52 = vpop.eup %805 }
 0x31d   : > { %736 = vmatmul.msk.f32.vlgmr.msra.gmra.mxu3 %vm367_vm6, %v806_v52  ;;  %v374_v13 = vsel %vm367_vm6, %v806_v52, 0.0 }
 0x31e   : > { %743 = vmatpush.xpose.msk.msra.mxu3 %vm342_vm5, %v536_v53 }
 0x325   : > { %738 = vmatmul.msk.f32.vlgmr.msrb.gmra.mxu3 %vm342_vm5, %v403_v40 }
 0x329   : > { %v441_v54 = vpop.permute.xlu1 %440 }
 0x32a   : > { %461 = vmatpush.msrb.mxu2 %v441_v54 }
 0x32d   : > { %744 = vmatmul.msk.f32.vlgmr.msra.gmra.mxu3 %vm342_vm5, %v534_v41 }
 0x354   : > { %v498_v60 = vpop.xlane.xlu1 %497 }
 0x355   : > { %v499_v61 = vsub.f32 %v493_v47, %v498_v60 }
 0x357   : > { %v500_v62 = vmul.f32 1.442695, %v499_v61 }
 0x359   : > { %807 = vpow2.f32 %v500_v62 }
 0x35f   : > { %v808_v63 = vpop.eup %807 }
 0x360   : > { %v502_v0 = vsel %vm367_vm6, %v808_v63, 0.0 }
 0x3a0   : > { %v1031_v55 = vpop.f32.mrf.mxu3 }
 0x3a8   : > { %v427_v56 = vpop.f32.mrf.mxu3 }
 0x3a9   : > { %v430_v57 = vsel %vm367_vm6, %v427_v56, -inf }
 0x3aa   : > { %431 = vmax.xlane.f32.xlu0 %v430_v57 }
 0x3b0   : > { %v558_v58 = vpop.f32.mrf.mxu3 }
 0x3b1   : > { %v561_v59 = vsel %vm367_vm6, %v558_v58, -inf }
 0x3b2   : > { %562 = vmax.xlane.f32.xlu2 %v561_v59 }
 0x3be   : > { %570 = vrot.lane.b32.xlu0 %v336_v38, %s890_s29  ;;  %s652_s29 = scalar_lea.sflag [#allocation3], %s240_s12 }
 0x3ca   : > { %505 = vrot.lane.b32.xlu2 %v336_v38, %s892_s10 }
 0x3f3   : > { %503 = vadd.xlane.f32.xlu2 %v502_v0 }
 0x41d   : > { %v432_v1 = vpop.xlane.xlu0 %431 }
 0x41e   : > { %v433_v2 = vsub.f32 %v427_v56, %v432_v1 }
 0x420   : > { %v434_v3 = vmul.f32 1.442695, %v433_v2 }
 0x422   : > { %809 = vpow2.f32 %v434_v3 }
 0x425   : > { %v563_v4 = vpop.xlane.xlu2 %562 }
 0x426   : > { %v564_v5 = vsub.f32 %v558_v58, %v563_v4 }
 0x428   : > { %v810_v6 = vpop.eup %809  ;;  %v565_v7 = vmul.f32 1.442695, %v564_v5 }
 0x429   : > { %739 = vmatmul.msk.f32.vlgmr.msrb.gmra.mxu2 %vm367_vm6, %v810_v6  ;;  %v436_v8 = vsel %vm367_vm6, %v810_v6, 0.0 }
 0x42a   : > { %811 = vpow2.f32 %v565_v7  ;;  %437 = vadd.xlane.f32.xlu0 %v436_v8 }
 0x42d   : > { %v506_v9 = vpop.permute.xlu2 %505 }
 0x42e   : > { %526 = vmatpush.msra.mxu1 %v506_v9 }
 0x42f   : > { %742 = vmatmul.msk.f32.vlgmr.msra.gmra.mxu1 %vm367_vm6, %v808_v63 }
 0x430   : > { %v812_v10 = vpop.eup %811  ;;  %v571_v11 = vpop.permute.xlu0 %570 }
 0x431   : > { %591 = vmatpush.msra.mxu2 %v571_v11  ;;  %v567_v12 = vsel %vm367_vm6, %v812_v10, 0.0 }
 0x432   : > { %568 = vadd.xlane.f32.xlu1 %v567_v12  ;;  %745 = vmatmul.msk.f32.vlgmr.msra.gmra.mxu2 %vm367_vm6, %v812_v10 }
 0x43a   : > { %375 = vadd.xlane.f32.xlu1 %v374_v13 }
 0x466   : > { %v504_v14 = vpop.xlane.xlu2 %503 }
 0x467   : > { %813 = vrcp.f32 %v504_v14 }
 0x46d   : > { %v814_v16 = vpop.eup %813 }
 0x49d   : > { %v438_v15 = vpop.xlane.xlu0 %437 }
 0x49e   : > { %815 = vrcp.f32 %v438_v15 }
 0x4a4   : > { %v816_v18 = vpop.eup %815 }
 0x4a5   : > { %v569_v17 = vpop.xlane.xlu1 %568 }
 0x4a6   : > { %817 = vrcp.f32 %v569_v17 }
 0x4ac   : > { %v463_v19 = vpop.f32.mrf.mxu2  ;;  %v528_v20 = vpop.f32.mrf.mxu1 }
 0x4ad   : > { %v467_v21 = vmul.f32 %v816_v18, %v463_v19  ;;  %v532_v22 = vmul.f32 %v814_v16, %v528_v20  ;;  %v818_v23 = vpop.eup %817  ;;  %v376_v34 = vpop.xlane.xlu1 %375 }
 0x4ae   : > { %819 = vrcp.f32 %v376_v34 }
 0x4af   : > { %603 = vrot.lane.b32.xlu0 %v532_v22, %s891_s9  ;;  %599 = vrot.lane.b32.xlu1 %v467_v21, %s886_s19  ;;  %s837_s9 = scalar_lea.hbm %s836_s25, 8 }
 0x4b0   : > { %p838_p11 = scmp.ne.s32.totalorder %s836_s25, %s837_s9 }
 0x4b2   : > { %p839_p12 = pnand %p838_p11, %p966_p5 }
 0x4b4   : > { %v820_v35 = vpop.eup %819  ;;  %p840_p13 = pneg %p839_p12 }
 0x4b5   : > { %v593_v24 = vpop.f32.mrf.mxu2  ;;  %v401_v36 = vmul.f32 %v820_v35, %v1031_v55 }
 0x4b6   : > { %v597_v25 = vmul.f32 %v818_v23, %v593_v24 }
 0x4b8   : > { %607 = vrot.lane.b32.xlu2 %v597_v25, %s887_s20  ;;  %s242_s20 = scalar_lea.vmem [#allocation2], %s730_s13  ;;  %s841_s13 = scalar_lea.hbm %s1116_s6, 16 }
 0x4b9   : > { %s664_s26 = sshll.u32 %s242_s20, 4  ;;  %p843_p1 = scmp.lt.s32.totalorder %s841_s13, %s837_s9  ;;  %s665_s26 = int_to_ptr.vmem [resolvable:$true] %s664_s26 }
 0x4bb   : > { %p844_p2 = por %p843_p1, %p842_p0 }
 0x4bd   : > { %p845_p3 = pnand %p844_p2, %p840_p13 }
 0x512   : > { %v608_v40 = vpop.permute.xlu2 %607 }
 0x521   : > { %v600_v37 = vpop.permute.xlu1 %599  ;;  %v604_v38 = vpop.permute.xlu0 %603 }
 0x522   : > { %v610_v39 = vsel %vm342_vm5, %v401_v36, %v600_v37 }
 0x523   : > { %v611_v41 = vsel %vm248_vm0, %v610_v39, %v604_v38 }
 0x524   : > { %v613_v42 = vsel %vm612_vm7, %v611_v41, %v608_v40 }
 0x525   : > { %746 = vmatmul.msk.f32.vlgmr.msrb.gmra.mxu0 %vm626_vm8, %v613_v42 }
 0x5a2   : > { %v647_v44 = vpop.f32.mrf.mxu0 }
 0x5a3   : > { %v648_v45 = vadd.f32 %v800_v43, %v647_v44 }
 0x5a5   : > { %650 = vst.msk [vmem:[%s242_s20] sm:$0xff] %vm248_vm0, %v648_v45 }
 0x5a6   : > { %848 = shalt.err (!%p845_p3)
}
 0x5a7   : > { %751 = dma.vmem_to_hbm [thread:$0]  (%p966_p5), %s665_s26, 128, %s667_s28, %s652_s29  }
 0x5a8 PF: > { %p757_p4 = scmp.ge.s32.totalorder %s883_s24, 2  ;;  %s678_s12 = sand.u32 1, %s871_s21  }
 0x5a9   : > { %s679_s16 = scalar_lea.sflag [#allocation3], %s678_s12 }
 0x5aa   : > { %p754_p7 = pnand %p757_p4, %p970_p6 }
 0x5ac   : > { %p755_p8 = pneg %p754_p7 }
 0x5ae   : > { %866 = dma.done.wait (%p755_p8), %s679_s16, 128  }
 0x5af   : > { %868 = vsyncadd (%p755_p8), %s679_s16, 4294967168  ;;  %p16_p9 = scmp.ge.s32.totalorder %s953_s27, 4   ;;  %s1119_s21 = smov %s875_s22 }
 0x5b0   : > { %s1120_s22 = smov %s879_s23  ;;  %s1121_s23 = smov %s964_s30 }
 0x5b1   : > { %s1122_s24 = smov %s953_s27  ;;  %18 = sbr.rel (!%p16_p9) target bundleno = 3 (0x3), region = 79 }
 0x5b6   :  { %685 = vsyncpa [#allocation3], 1 }
 0x5b7   :  { %687 = vsyncpa [#allocation3 + $0x1], 1 }

</bundles_post_ra>
